<compile_context>
chip_gen: v7x
topology: tpu7x:2x2x1
jax: 0.10.0
libtpu: 0.0.40
codegen_flags: <defaults>
</compile_context>

<pallas_src>
import functools

import jax
import jax.numpy as jnp
import numpy as np
from jax import lax
from jax.experimental import pallas as pl
from jax.experimental.pallas import tpu as pltpu


def _round_up(x: int, m: int) -> int:
    return ((x + m - 1) // m) * m


def _vmem_capacity_bytes() -> int:
    """Per-core VMEM capacity; conservative (v7x) fallback if the query fails."""
    try:
        info = pltpu.get_tpu_info()
        cap = getattr(info, "vmem_capacity_bytes", None)
        if cap:
            return int(cap)
    except Exception:
        pass
    return 64 * 1024 * 1024


# ---------------------------------------------------------------------------
# Kernels
# ---------------------------------------------------------------------------
def _small_kernel(x_ref, w_ref, b_ref, o_ref):
    """Fast path: whole W and bias VMEM-resident, 1-D grid over M."""
    o_ref[...] = (
        jnp.dot(x_ref[...], w_ref[...], preferred_element_type=jnp.float32)
        + b_ref[...].astype(jnp.float32)
    ).astype(o_ref.dtype)


def _make_matmul_kernel(k_rem: int, use_acc: bool):
    """General path: (i, j, k) grid, bias folded into k==0 init, optional f32 scratch.

    k_rem != 0 means the last K block overhangs the true K extent; both the x columns
    and the W rows beyond k_rem are masked to zero so garbage (incl. NaNs) in the
    overhang region cannot reach the contraction.
    """

    def kernel(x_ref, w_ref, b_ref, o_ref, *scratch):
        acc_ref = scratch[0] if use_acc else o_ref
        k = pl.program_id(2)
        nk = pl.num_programs(2)

        @pl.when(k == 0)
        def _():
            acc_ref[...] = jnp.broadcast_to(
                b_ref[...].astype(jnp.float32), acc_ref.shape
            )

        x = x_ref[...]
        w = w_ref[...]
        if k_rem:
            kk = jnp.where(k == nk - 1, k_rem, x.shape[1])
            x = jnp.where(
                lax.broadcasted_iota(jnp.int32, x.shape, 1) < kk,
                x, jnp.zeros_like(x))
            w = jnp.where(
                lax.broadcasted_iota(jnp.int32, w.shape, 0) < kk,
                w, jnp.zeros_like(w))

        acc_ref[...] += jnp.dot(x, w, preferred_element_type=jnp.float32)

        if use_acc:
            @pl.when(k == nk - 1)
            def _():
                o_ref[...] = acc_ref[...].astype(o_ref.dtype)

    return kernel


# ---------------------------------------------------------------------------
# Wrapper
# ---------------------------------------------------------------------------
@functools.partial(
    jax.jit,
    static_argnames=("tile_m", "tile_n", "tile_k", "compute_dtype", "allow_fast_path"),
)
def prepare_layer(x, weight, bias, *, tile_m=512, tile_n=2048, tile_k=512,
                  compute_dtype="auto", allow_fast_path=True):
    """y = x @ weight + bias   (x: [M, K], weight: [K, N], bias: [N])."""
    M, K = x.shape
    K2, N = weight.shape
    assert K == K2, (K, K2)
    assert bias.shape == (N,), bias.shape

    out_dtype = x.dtype

    # bf16 operands (f32 accumulation) for large problems: halves HBM traffic and
    # hits the native MXU dtype on v5e/v6e/v7x.  Explicit opt-out: compute_dtype=None.
    if compute_dtype == "auto":
        big = (M * K + K * N) >= (1 << 24)  # >= 64 MiB of f32 operands
        compute_dtype = jnp.bfloat16 if (big and x.dtype == jnp.float32) else None
    if compute_dtype is not None:
        x = x.astype(compute_dtype)
        weight = weight.astype(compute_dtype)

    bias2d = bias.reshape(1, N).astype(jnp.float32)

    xi = x.dtype.itemsize
    wi = weight.dtype.itemsize
    oi = jnp.dtype(out_dtype).itemsize
    sub = 16 if x.dtype == jnp.bfloat16 else 8

    vmem_cap = _vmem_capacity_bytes()
    budget = int(0.55 * vmem_cap)   # leave headroom for pipeline/internal scratch

    # ---------------- small-problem fast path (the module's actual use) -------------
    if allow_fast_path and K * N * wi <= (2 << 20):
        tm = max(sub, min(_round_up(tile_m, sub), _round_up(M, sub)))

        def fast_bytes(tm_):
            return (2 * tm_ * K * xi + 2 * K * N * wi + 2 * N * 4
                    + 2 * tm_ * N * oi)

        while fast_bytes(tm) > budget and tm > sub:
            tm = max(sub, _round_up(tm // 2, sub))

        return pl.pallas_call(
            _small_kernel,
            out_shape=jax.ShapeDtypeStruct((M, N), out_dtype),
            grid_spec=pltpu.PrefetchScalarGridSpec(
                num_scalar_prefetch=0,
                grid=(pl.cdiv(M, tm),),
                in_specs=[
                    pl.BlockSpec((tm, K), lambda i: (i, 0)),   # x row panel
                    pl.BlockSpec((K, N), lambda i: (0, 0)),    # whole W, resident
                    pl.BlockSpec((1, N), lambda i: (0, 0)),    # whole bias, resident
                ],
                out_specs=pl.BlockSpec((tm, N), lambda i: (i, 0)),
            ),
            compiler_params=pltpu.CompilerParams(
                dimension_semantics=("parallel",),
                vmem_limit_bytes=int(min(vmem_cap,
                                         max(32 << 20, fast_bytes(tm) + (8 << 20)))),
            ),
            cost_estimate=pl.CostEstimate(
                flops=2 * M * N * K, transcendentals=0,
                bytes_accessed=M * K * xi + K * N * wi + N * 4 + M * N * oi),
        )(x, weight, bias2d)

    # ---------------- general tiled path --------------------------------------------
    Np128 = _round_up(N, 128)
    Kp128 = _round_up(K, 128)

    tm = max(sub, min(_round_up(tile_m, sub), _round_up(M, sub)))
    tk = max(128, min(_round_up(tile_k, 128), Kp128))
    tn = max(128, min(_round_up(tile_n, 128), Np128))  # large default -> full-N panels

    use_acc = jnp.dtype(out_dtype) != jnp.dtype(jnp.float32)

    def vmem_bytes(tm_, tn_, tk_):
        b = (2 * tm_ * tk_ * xi      # x blocks (double-buffered)
             + 2 * tk_ * tn_ * wi    # W blocks
             + 2 * tn_ * 4           # bias blocks
             + 2 * tm_ * tn_ * oi)   # output blocks
        if use_acc:
            b += tm_ * tn_ * 4       # f32 accumulator scratch
        return b

    # Shrink tiles until the per-step footprint fits the per-core VMEM budget.
    while vmem_bytes(tm, tn, tk) > budget:
        if tn > 512:
            tn = max(512, _round_up(tn // 2, 128))
        elif tk > 256:
            tk = max(256, _round_up(tk // 2, 128))
        elif tm > 128:
            tm = max(128, _round_up(tm // 2, sub))
        elif tn > 128:
            tn = max(128, _round_up(tn // 2, 128))
        else:
            break

    # If the N axis collapsed to one tile, keep >=2 parallel M tiles (v7x: 2 TCs).
    if pl.cdiv(N, tn) == 1 and pl.cdiv(M, tm) == 1 and M > sub:
        tm = max(sub, _round_up(-(-M // 2), sub))

    n_i, n_j, n_k = pl.cdiv(M, tm), pl.cdiv(N, tn), pl.cdiv(K, tk)
    k_rem = K % tk  # nonzero -> last K block overhangs, masked in-kernel

    kernel = _make_matmul_kernel(k_rem, use_acc)
    scratch = [pltpu.VMEM((tm, tn), jnp.float32)] if use_acc else []

    cost = pl.CostEstimate(
        flops=2 * M * N * K,
        transcendentals=0,
        # honest HBM traffic including re-stream factors of this tiling
        bytes_accessed=M * K * xi * n_j + K * N * wi * n_i + N * 4 + M * N * oi,
    )

    return pl.pallas_call(
        kernel,
        out_shape=jax.ShapeDtypeStruct((M, N), out_dtype),
        grid_spec=pltpu.PrefetchScalarGridSpec(
            num_scalar_prefetch=0,
            grid=(n_i, n_j, n_k),
            in_specs=[
                pl.BlockSpec((tm, tk), lambda i, j, k: (i, k)),
                pl.BlockSpec((tk, tn), lambda i, j, k: (k, j)),
                pl.BlockSpec((1, tn), lambda i, j, k: (0, j)),
            ],
            out_specs=pl.BlockSpec((tm, tn), lambda i, j, k: (i, j)),
            scratch_shapes=scratch,
        ),
        compiler_params=pltpu.CompilerParams(
            dimension_semantics=("parallel", "parallel", "arbitrary"),
            vmem_limit_bytes=int(min(vmem_cap,
                                     max(32 << 20, vmem_bytes(tm, tn, tk) + (8 << 20)))),
        ),
        cost_estimate=cost,
    )(x, weight, bias2d)


def glorot_init(key, in_features, out_features, dtype=jnp.float32):
    # Matches the PyTorch glorot(): uniform(-r, r), r = sqrt(6 / (in + out))
    init_range = np.sqrt(6.0 / (in_features + out_features))
    return jax.random.uniform(
        key, (in_features, out_features), dtype=dtype,
        minval=-init_range, maxval=init_range,
    )


if __name__ == "__main__":
    key = jax.random.PRNGKey(0)
    k_x, k_w, k_x2, k_w2, k_b2 = jax.random.split(key, 5)

    # --- Toy shapes matching the module's use (in=32, out=32, 16 rows): fast path ---
    in_features, out_features, M = 32, 32, 16
    x = jax.random.normal(k_x, (M, in_features), dtype=jnp.float32)
    weight = glorot_init(k_w, in_features, out_features)
    bias = jnp.zeros((out_features,), dtype=jnp.float32)

    out = jax.block_until_ready(prepare_layer(x, weight, bias))
    ref = x @ weight + bias
    np.testing.assert_allclose(np.asarray(out), np.asarray(ref), rtol=1e-5, atol=1e-5)

    # --- Ragged shapes, forced onto the general 3-D path with small tiles to exercise
    #     M/N edge blocks + in-kernel K masking (f32 -> direct o_ref accumulation). ---
    M2, K2, N2 = 300, 200, 170
    x2 = jax.random.normal(k_x2, (M2, K2), dtype=jnp.float32)
    w2 = glorot_init(k_w2, K2, N2)
    b2 = jax.random.normal(k_b2, (N2,), dtype=jnp.float32)

    out2 = jax.block_until_ready(
        prepare_layer(x2, w2, b2, tile_m=64, tile_n=128, tile_k=128,
                      compute_dtype=None, allow_fast_path=False))
    ref2 = x2 @ w2 + b2
    np.testing.assert_allclose(np.asarray(out2), np.asarray(ref2), rtol=1e-5, atol=1e-5)

    # --- bf16 operands / bf16 output: exercises the f32 accumulator scratch path. ---
    x3 = x2.astype(jnp.bfloat16)
    w3 = w2.astype(jnp.bfloat16)
    out3 = jax.block_until_ready(
        prepare_layer(x3, w3, b2, tile_m=128, tile_n=128, tile_k=128,
                      compute_dtype=None, allow_fast_path=False))
    ref3 = x3.astype(jnp.float32) @ w3.astype(jnp.float32) + b2
    np.testing.assert_allclose(np.asarray(out3).astype(np.float32), np.asarray(ref3),
                               rtol=2e-2, atol=2e-2)

    print("KERNEL_OK")
</pallas_src>

<mosaic_0001>
module attributes {stable_mosaic.version = 11 : i64} {
  func.func @_small_kernel(%arg0: i32, %arg1: memref<16x32xf32, #tpu.memory_space<vmem>>, %arg2: memref<32x32xf32, #tpu.memory_space<vmem>>, %arg3: memref<1x32xf32, #tpu.memory_space<vmem>>, %arg4: memref<16x32xf32, #tpu.memory_space<vmem>>) attributes {dimension_semantics = [#tpu.dimension_semantics<parallel>], iteration_bounds = array<i64: 1>, scalar_prefetch = 0 : i64, scratch_operands = 0 : i64, tpu.core_type = #tpu.core_type<tc>, window_params = [{transform_indices = @transform_0, window_bounds = array<i64: 16, 32>}, {pipeline_mode = #tpu.pipeline_mode<synchronous>, transform_indices = @transform_1, window_bounds = array<i64: 32, 32>}, {pipeline_mode = #tpu.pipeline_mode<synchronous>, transform_indices = @transform_2, window_bounds = array<i64: 1, 32>}, {transform_indices = @transform_3, window_bounds = array<i64: 16, 32>}]} {
    %c0 = arith.constant 0 : index
    %c0_0 = arith.constant 0 : index
    %0 = vector.load %arg1[%c0, %c0_0] : memref<16x32xf32, #tpu.memory_space<vmem>>, vector<16x32xf32>
    %c0_1 = arith.constant 0 : index
    %c0_2 = arith.constant 0 : index
    %1 = vector.load %arg2[%c0_1, %c0_2] : memref<32x32xf32, #tpu.memory_space<vmem>>, vector<32x32xf32>
    %cst = arith.constant dense<0.000000e+00> : vector<16x32xf32>
    %2 = tpu.matmul %0, %1, %cst {dimension_numbers = #tpu.dot_dimension_numbers<[1], [0], [0], [1], [0, 0, 1, 1], [], []>} : vector<16x32xf32>, vector<32x32xf32>, vector<16x32xf32> -> vector<16x32xf32>
    %c0_3 = arith.constant 0 : index
    %c0_4 = arith.constant 0 : index
    %3 = vector.load %arg3[%c0_3, %c0_4] : memref<1x32xf32, #tpu.memory_space<vmem>>, vector<1x32xf32>
    %4 = vector.broadcast %3 : vector<1x32xf32> to vector<16x32xf32>
    %5 = arith.addf %2, %4 : vector<16x32xf32>
    %c0_5 = arith.constant 0 : index
    %c0_6 = arith.constant 0 : index
    %6 = vector.load %arg4[%c0_5, %c0_6] : memref<16x32xf32, #tpu.memory_space<vmem>>, vector<16x32xf32>
    tpu.vector_store %arg4[%c0_5, %c0_6], %5 {strides = array<i32>} : memref<16x32xf32, #tpu.memory_space<vmem>>, vector<16x32xf32>,
    return
  }
  func.func @transform_0(%arg0: i32) -> (i32, i32) {
    %c0_i32 = arith.constant 0 : i32
    %c0_i32_0 = arith.constant 0 : i32
    return %arg0, %c0_i32 : i32, i32
  }
  func.func @transform_1(%arg0: i32) -> (i32, i32) {
    %c0_i32 = arith.constant 0 : i32
    %c0_i32_0 = arith.constant 0 : i32
    %c0_i32_1 = arith.constant 0 : i32
    return %c0_i32, %c0_i32_0 : i32, i32
  }
  func.func @transform_2(%arg0: i32) -> (i32, i32) {
    %c0_i32 = arith.constant 0 : i32
    %c0_i32_0 = arith.constant 0 : i32
    %c0_i32_1 = arith.constant 0 : i32
    return %c0_i32, %c0_i32_0 : i32, i32
  }
  func.func @transform_3(%arg0: i32) -> (i32, i32) {
    %c0_i32 = arith.constant 0 : i32
    %c0_i32_0 = arith.constant 0 : i32
    return %arg0, %c0_i32 : i32, i32
  }
}

</mosaic_0001>

<bundles_post_ra>
// kernel: prepare_layer.1
= control target key start
LH: loop header
LB: loop body
LE: loop exit
PB: predicated region body
PF: predicated region fallthrough
CT: control target
= control target key end

     0   :  { %8 = vsyncpa [#allocation3], 0  ;;  %s340_s0 = inlined_call_operand.hbm [shape: f32[16,32], index: 0, kind: input, shape index: {}]   ;;  %s341_s1 = inlined_call_operand.hbm [shape: f32[32,32], index: 1, kind: input, shape index: {}]   ;;  %s342_s2 = inlined_call_operand.vmem [shape: f32[1,32], index: 2, kind: input, shape index: {}]   ;;  %s343_s3 = inlined_call_operand.hbm [shape: f32[16,32], index: 3, kind: output, shape index: {}]  }
   0x1   :  { %9 = vsyncpa [#allocation6], 0 }
   0x2   :  { %10 = vsyncpa [#allocation4], 0  ;;  %s263_s12 = smov [#allocation2]   ;;  %s191_s16 = scalar_lea.hbm %s340_s0, 256 }
   0x3   :  { %s16_s13 = sshll.u32 %s263_s12, 4  ;;  %p192_p0 = scmp.ne.s32.totalorder %s340_s0, %s191_s16  ;;  %s17_s13 = int_to_ptr.vmem [resolvable:$true] %s16_s13 }
   0x4   :  { %p195_p1 = scmp.lt.u32.totalorder %s191_s16, %s340_s0 }
   0x6   :  { %p197_p2 = pnand %p195_p1, %p192_p0 }
   0x8   :  { %200 = shalt.err (!%p197_p2)
}
   0x9   :  { %s201_s21 = scalar_lea.vmem %s17_s13, 256  ;;  %p206_p4 = scmp.lt.s32.totalorder %s17_s13, %s17_s13 }
   0xa   :  { %p202_p3 = scmp.ne.s32.totalorder %s17_s13, %s201_s21  ;;  %p207_p5 = scmp.lt.s32.totalorder %s201_s21, %s201_s21 }
   0xc   :  { %p208_p6 = por %p207_p5, %p206_p4 }
   0xe   :  { %p209_p7 = pnand %p208_p6, %p202_p3 }
  0x10   :  { %212 = shalt.err (!%p209_p7)
}
  0x11   :  { %s264_s22 = smov 128   ;;  %s265_s23 = smov 8  }
  0x12   :  { %22 = dma.hbm_to_vmem [thread:$0]  %s340_s0, 256, %s17_s13, [#allocation3], %s264_s22, %s264_s22, %s265_s23  }
  0x13   :  { %s266_s26 = smov [#allocation5]   ;;  %s213_s30 = scalar_lea.hbm %s341_s1, 512 }
  0x14   :  { %s28_s27 = sshll.u32 %s266_s26, 4  ;;  %p214_p8 = scmp.ne.s32.totalorder %s341_s1, %s213_s30  ;;  %s29_s27 = int_to_ptr.vmem [resolvable:$true] %s28_s27 }
  0x15   :  { %p217_p9 = scmp.lt.u32.totalorder %s213_s30, %s341_s1 }
  0x17   :  { %p219_p10 = pnand %p217_p9, %p214_p8 }
  0x19   :  { %222 = shalt.err (!%p219_p10)
}
  0x1a   :  { %s223_s8 = scalar_lea.vmem %s29_s27, 512  ;;  %p228_p12 = scmp.lt.s32.totalorder %s29_s27, %s29_s27 }
  0x1b   :  { %p224_p11 = scmp.ne.s32.totalorder %s29_s27, %s223_s8  ;;  %p229_p13 = scmp.lt.s32.totalorder %s223_s8, %s223_s8 }
  0x1d   :  { %p230_p0 = por %p229_p13, %p228_p12 }
  0x1f   :  { %p231_p1 = pnand %p230_p0, %p224_p11 }
  0x21   :  { %234 = shalt.err (!%p231_p1)
}
  0x22   :  { %34 = dma.hbm_to_vmem [thread:$0]  %s341_s1, 512, %s29_s27, [#allocation6], %s264_s22, %s264_s22, %s265_s23  }
  0x23   :  { %257 = dma.done.wait [#allocation3], 256  }
  0x24   :  { %258 = vsyncadd [#allocation3], 4294967040 }
  0x25   :  { %259 = dma.done.wait [#allocation6], 512  }
  0x26   :  { %260 = vsyncadd [#allocation6], 4294966784  ;;  %vm56_vm0 = vcmask 261120   ;;  %v45_v0 = vld [vmem:[#allocation5] sm:$0xff]  ;;  %v46_v1 = vld [vmem:[#allocation5 + $0x8] sm:$0xff]  ;;  %s267_s11 = smov [#allocation7]  }
  0x27   :  { %v47_v2 = vld [vmem:[#allocation5 + $0x10] sm:$0xff]  ;;  %v178_v3 = vpack.c.bf16 %v46_v1, %v45_v0  ;;  %v48_v4 = vld [vmem:[#allocation5 + $0x18] sm:$0xff]  ;;  %s145_s12 = sshll.u32 %s267_s11, 4  ;;  %s146_s12 = int_to_ptr.vmem [resolvable:$true] %s145_s12 }
  0x28   :  { %v43_v5 = vld [vmem:[#allocation2] sm:$0xff]  ;;  %v182_v6 = vpack.c.bf16 %v48_v4, %v47_v2  ;;  %v44_v7 = vld [vmem:[#allocation2 + $0x8] sm:$0xff]  ;;  %s235_s13 = scalar_lea.vmem %s146_s12, 256  ;;  %p240_p3 = scmp.lt.s32.totalorder %s146_s12, %s146_s12 }
  0x29   :  { %175 = vmatprep.mubr.msk.f32.mxu0 %vm56_vm0, %v43_v5  ;;  %179 = vmatprep.subr.bf16.mxu0 %v178_v3  ;;  %v158_v8 = vld [vmem:[%s342_s2] ss:$0 sm:$0xff]  ;;  %p236_p2 = scmp.ne.s32.totalorder %s146_s12, %s235_s13  ;;  %p241_p4 = scmp.lt.s32.totalorder %s235_s13, %s235_s13 }
  0x2a   :  { %181 = vmatpush3.bf16.msra.mxu0 %v178_v3 }
  0x2b   :  { %183 = vmatprep.subr.bf16.mxu0 %v182_v6  ;;  %p242_p5 = por %p241_p4, %p240_p3 }
  0x2d   :  { %p243_p6 = pnand %p242_p5, %p236_p2 }
  0x2e   :  { %185 = vmatpush3.bf16.msra.mxu0 %v182_v6 }
  0x31   :  { %176 = vmatmul.mubr.msk.f32.vlgmr.msra.gmra.mrb[0].mxu0 %vm56_vm0, %v44_v7 }
 0x104   :  { %v177_v9 = vpop.f32.mrb[0].mxu0 }
 0x105   :  { %v135_v10 = vadd.f32 %v177_v9, %v158_v8  ;;  %v129_v11 = vpop.f32.mrb[1].mxu0 }
 0x106   :  { %v130_v12 = vadd.f32 %v158_v8, %v129_v11 }
 0x107   :  { %139 = vst.msk [vmem:[#allocation7 + $0x8] sm:$0xff] %vm56_vm0, %v135_v10 }
 0x108   :  { %138 = vst.msk [vmem:[#allocation7] sm:$0xff] %vm56_vm0, %v130_v12 }
 0x109   :  { %246 = shalt.err (!%p243_p6)
}
 0x10a   :  { %s247_s15 = scalar_lea.hbm %s343_s3, 256 }
 0x10b   :  { %p248_p7 = scmp.ne.s32.totalorder %s343_s3, %s247_s15  ;;  %p251_p8 = scmp.lt.u32.totalorder %s247_s15, %s343_s3 }
 0x10d   :  { %p253_p9 = pnand %p251_p8, %p248_p7 }
 0x10f   :  { %256 = shalt.err (!%p253_p9)
}
 0x110   :  { %151 = dma.vmem_to_hbm [thread:$0]  %s146_s12, 256, %s343_s3, [#allocation4], %s264_s22, %s264_s22, %s265_s23  }
 0x111   :  { %261 = dma.done.wait [#allocation4], 256  }
 0x112   :  { %262 = vsyncadd [#allocation4], 4294967040 }
 0x113   :  { %155 = vsyncpa [#allocation3], 1 }
 0x114   :  { %156 = vsyncpa [#allocation6], 1 }
 0x115   :  { %157 = vsyncpa [#allocation4], 1 }

</bundles_post_ra>
